<compile_context>
chip_gen: v7x
topology: tpu7x:2x2x1
jax: 0.10.0
libtpu: 0.0.40
codegen_flags: <defaults>
</compile_context>

<pallas_src>
import jax
import jax.numpy as jnp
from jax.experimental import pallas as pl
from jax.experimental.pallas import tpu as pltpu

_LANES = 128
# Target bytes per input tile per grid step (~4 MiB -> 8 MiB/step for 2 inputs).
_TARGET_TILE_BYTES = 4 * 1024 * 1024
# Leading "parallel" grid axis size: shards the stream across the 2 TCs on
# v7x; on 1-TC chips it just becomes two serial passes over disjoint blocks.
_NUM_CORES = 2


def _make_kernel(total_rows, tile_rows, blocks_per_core, need_row_mask):
    """Builds the kernel with static shape info closed over."""

    def kernel(p_ref, g_ref, sum_ref, cnt_ref):
        i = pl.program_id(1)  # inner ("arbitrary") reduction axis

        @pl.when(i == 0)
        def _():
            sum_ref[...] = jnp.zeros_like(sum_ref)
            cnt_ref[...] = jnp.zeros_like(cnt_ref)

        # Cast after the DMA (VPU work, hidden under the HBM stream).
        p = p_ref[...].astype(jnp.float32)
        g = g_ref[...].astype(jnp.float32)

        valid = g >= 0.0
        if need_row_mask:
            # Blocks past the end of the array (partial last block, or the
            # clamped blocks of the shorter core) contain unspecified data:
            # mask them out by global row index BEFORE squaring so garbage
            # (possibly NaN) never propagates.
            c = pl.program_id(0)
            base = (c * blocks_per_core + i) * tile_rows
            row_ids = jax.lax.broadcasted_iota(jnp.int32, p.shape, 0) + base
            valid = valid & (row_ids < total_rows)

        diff = jnp.where(valid, p - g, 0.0)
        # Sublane-axis reduce only; keep lane-wide partials resident in the
        # (per-core) output block, which acts as the accumulator across `i`.
        sum_ref[...] += jnp.sum(diff * diff, axis=0, keepdims=True)[None]
        cnt_ref[...] += jnp.sum(valid.astype(jnp.int32), axis=0, keepdims=True)[None]

    return kernel


def masked_mse(preds, gts):
    # Glue (shape fixing) stays in plain JAX.
    if preds.shape != gts.shape:
        preds = jnp.squeeze(preds, axis=1)
    assert preds.shape == gts.shape

    p = preds.reshape(-1)
    g = gts.reshape(-1)
    n = p.shape[0]

    rows = n // _LANES          # 128-aligned prefix handled by the kernel
    n_main = rows * _LANES      # remaining (<128) tail handled in the wrapper

    total_sum = jnp.zeros((), jnp.float32)
    total_cnt = jnp.zeros((), jnp.float32)

    if rows > 0:
        if n_main == n:
            # Common case: pure reshape, zero extra HBM traffic.
            p2 = p.reshape(rows, _LANES)
            g2 = g.reshape(rows, _LANES)
        else:
            # Ragged case: slice the aligned prefix (one copy; cheaper than the
            # previous pad path which also wrote pad values for both arrays).
            p2 = p[:n_main].reshape(rows, _LANES)
            g2 = g[:n_main].reshape(rows, _LANES)

        # Dtype-aware tile: ~4 MiB per input per step.
        itemsize = max(p2.dtype.itemsize, g2.dtype.itemsize)
        tile_rows = _TARGET_TILE_BYTES // (_LANES * itemsize)
        tile_rows = max(32, (tile_rows // 32) * 32)
        if rows <= tile_rows:
            tile_rows = rows  # full-dim block is always legal

        num_blocks = pl.cdiv(rows, tile_rows)
        num_cores = _NUM_CORES if num_blocks >= _NUM_CORES else 1
        bpc = pl.cdiv(num_blocks, num_cores)          # blocks per core
        need_row_mask = (num_cores * bpc * tile_rows) != rows

        kernel = _make_kernel(rows, tile_rows, bpc, need_row_mask)

        def in_map(c, i):
            # Clamp so overhanging (c, i) steps re-read the last block; their
            # contribution is zeroed by the in-kernel row mask.
            return (jnp.minimum(c * bpc + i, num_blocks - 1), 0)

        bytes_accessed = int(
            p2.size * p2.dtype.itemsize
            + g2.size * g2.dtype.itemsize
            + 2 * num_cores * _LANES * 4
        )

        sums, cnts = pl.pallas_call(
            kernel,
            out_shape=(
                jax.ShapeDtypeStruct((num_cores, 1, _LANES), jnp.float32),
                jax.ShapeDtypeStruct((num_cores, 1, _LANES), jnp.int32),
            ),
            grid_spec=pltpu.PrefetchScalarGridSpec(
                num_scalar_prefetch=0,
                grid=(num_cores, bpc),
                in_specs=[
                    pl.BlockSpec((tile_rows, _LANES), in_map),
                    pl.BlockSpec((tile_rows, _LANES), in_map),
                ],
                out_specs=(
                    pl.BlockSpec((1, 1, _LANES), lambda c, i: (c, 0, 0)),
                    pl.BlockSpec((1, 1, _LANES), lambda c, i: (c, 0, 0)),
                ),
            ),
            compiler_params=pltpu.CompilerParams(
                # Core split across v7x's 2 TCs; reduction axis stays serial.
                dimension_semantics=("parallel", "arbitrary"),
                # 2 inputs x 2 pipeline buffers x <=4 MiB = <=16 MiB; raise the
                # scoped limit so v5e's 16 MiB default does not reject it.
                vmem_limit_bytes=32 * 1024 * 1024,
            ),
            cost_estimate=pl.CostEstimate(
                flops=5 * n_main, transcendentals=0, bytes_accessed=bytes_accessed
            ),
        )(p2, g2)

        total_sum = total_sum + jnp.sum(sums)
        total_cnt = total_cnt + jnp.sum(cnts).astype(jnp.float32)

    if n_main != n:
        # <=127-element tail: trivial jnp reduction, combined before the divide.
        pt = p[n_main:].astype(jnp.float32)
        gt = g[n_main:].astype(jnp.float32)
        m = gt >= 0.0
        d = jnp.where(m, pt - gt, 0.0)
        total_sum = total_sum + jnp.sum(d * d)
        total_cnt = total_cnt + jnp.sum(m).astype(jnp.float32)

    # NaN when no element is valid (matches torch mean over an empty selection).
    return total_sum / total_cnt


def _reference(p, g):
    mask = g >= 0
    return jnp.sum(jnp.where(mask, (p - g) ** 2, 0.0)) / jnp.sum(
        mask.astype(jnp.float32)
    )


if __name__ == "__main__":
    key = jax.random.PRNGKey(0)
    kp, kg, kp2, kg2 = jax.random.split(key, 4)

    # Case 1: preds has an extra singleton channel dim -> exercises squeeze(1);
    # flat size 512 is 128-aligned -> zero-copy kernel path.
    preds = jax.random.normal(kp, (2, 1, 16, 16), dtype=jnp.float32)
    gts = jax.random.uniform(
        kg, (2, 16, 16), dtype=jnp.float32, minval=-1.0, maxval=1.0
    )
    loss = masked_mse(preds, gts)
    jax.block_until_ready(loss)
    ref = _reference(jnp.squeeze(preds, axis=1), gts)
    assert jnp.allclose(loss, ref, rtol=1e-5, atol=1e-6), (loss, ref)

    # Case 2: ragged flat size (389 = 3*128 + 5) -> kernel on the aligned
    # prefix + jnp tail combined in the wrapper.
    preds2 = jax.random.normal(kp2, (389,), dtype=jnp.float32)
    gts2 = jax.random.uniform(
        kg2, (389,), dtype=jnp.float32, minval=-1.0, maxval=1.0
    )
    loss2 = masked_mse(preds2, gts2)
    jax.block_until_ready(loss2)
    ref2 = _reference(preds2, gts2)
    assert jnp.allclose(loss2, ref2, rtol=1e-5, atol=1e-6), (loss2, ref2)

    print("KERNEL_OK")
</pallas_src>

<mosaic_0001>
module attributes {stable_mosaic.version = 11 : i64} {
  func.func @kernel(%arg0: i32, %arg1: i32, %arg2: memref<4x128xf32, #tpu.memory_space<vmem>>, %arg3: memref<4x128xf32, #tpu.memory_space<vmem>>, %arg4: memref<1x1x128xf32, #tpu.memory_space<vmem>>, %arg5: memref<1x1x128xi32, #tpu.memory_space<vmem>>) attributes {dimension_semantics = [#tpu.dimension_semantics<parallel>, #tpu.dimension_semantics<arbitrary>], iteration_bounds = array<i64: 1, 1>, scalar_prefetch = 0 : i64, scratch_operands = 0 : i64, tpu.core_type = #tpu.core_type<tc>, window_params = [{transform_indices = @transform_0, window_bounds = array<i64: 4, 128>}, {transform_indices = @transform_1, window_bounds = array<i64: 4, 128>}, {transform_indices = @transform_2, window_bounds = array<i64: 1, 1, 128>}, {transform_indices = @transform_3, window_bounds = array<i64: 1, 1, 128>}]} {
    %c0_i32 = arith.constant 0 : i32
    %0 = arith.cmpi eq, %arg1, %c0_i32 : i32
    %1 = arith.extui %0 : i1 to i32
    %c0_i32_0 = arith.constant 0 : i32
    %2 = arith.cmpi ne, %1, %c0_i32_0 : i32
    scf.if %2 {
      %cst_19 = arith.constant 0.000000e+00 : f32
      %24 = vector.broadcast %cst_19 : f32 to vector<1x1x128xf32>
      %c0_20 = arith.constant 0 : index
      %c0_21 = arith.constant 0 : index
      %c0_22 = arith.constant 0 : index
      %25 = vector.load %arg4[%c0_20, %c0_21, %c0_22] : memref<1x1x128xf32, #tpu.memory_space<vmem>>, vector<1x1x128xf32>
      tpu.vector_store %arg4[%c0_20, %c0_21, %c0_22], %24 {strides = array<i32>} : memref<1x1x128xf32, #tpu.memory_space<vmem>>, vector<1x1x128xf32>,
      %c0_i32_23 = arith.constant 0 : i32
      %26 = vector.broadcast %c0_i32_23 : i32 to vector<1x1x128xi32>
      %c0_24 = arith.constant 0 : index
      %c0_25 = arith.constant 0 : index
      %c0_26 = arith.constant 0 : index
      %27 = vector.load %arg5[%c0_24, %c0_25, %c0_26] : memref<1x1x128xi32, #tpu.memory_space<vmem>>, vector<1x1x128xi32>
      tpu.vector_store %arg5[%c0_24, %c0_25, %c0_26], %26 {strides = array<i32>} : memref<1x1x128xi32, #tpu.memory_space<vmem>>, vector<1x1x128xi32>,
    } else {
    }
    %c0 = arith.constant 0 : index
    %c0_1 = arith.constant 0 : index
    %3 = vector.load %arg2[%c0, %c0_1] : memref<4x128xf32, #tpu.memory_space<vmem>>, vector<4x128xf32>
    %c0_2 = arith.constant 0 : index
    %c0_3 = arith.constant 0 : index
    %4 = vector.load %arg3[%c0_2, %c0_3] : memref<4x128xf32, #tpu.memory_space<vmem>>, vector<4x128xf32>
    %cst = arith.constant 0.000000e+00 : f32
    %5 = vector.broadcast %cst : f32 to vector<4x128xf32>
    %6 = arith.cmpf oge, %4, %5 : vector<4x128xf32>
    %7 = arith.subf %3, %4 : vector<4x128xf32>
    %cst_4 = arith.constant 0.000000e+00 : f32
    %8 = vector.broadcast %cst_4 : f32 to vector<4x128xf32>
    %9 = arith.select %6, %7, %8 : vector<4x128xi1>, vector<4x128xf32>
    %c0_5 = arith.constant 0 : index
    %c0_6 = arith.constant 0 : index
    %c0_7 = arith.constant 0 : index
    %10 = vector.load %arg4[%c0_5, %c0_6, %c0_7] : memref<1x1x128xf32, #tpu.memory_space<vmem>>, vector<1x1x128xf32>
    %11 = arith.mulf %9, %9 : vector<4x128xf32>
    %cst_8 = arith.constant dense<0.000000e+00> : vector<128xf32>
    %12 = vector.multi_reduction <add>, %11, %cst_8 [0] : vector<4x128xf32> to vector<128xf32>
    %13 = vector.shape_cast %12 : vector<128xf32> to vector<1x128xf32>
    %14 = vector.shape_cast %13 : vector<1x128xf32> to vector<1x1x128xf32>
    %15 = arith.addf %10, %14 : vector<1x1x128xf32>
    %c0_9 = arith.constant 0 : index
    %c0_10 = arith.constant 0 : index
    %c0_11 = arith.constant 0 : index
    %16 = vector.load %arg4[%c0_9, %c0_10, %c0_11] : memref<1x1x128xf32, #tpu.memory_space<vmem>>, vector<1x1x128xf32>
    tpu.vector_store %arg4[%c0_9, %c0_10, %c0_11], %15 {strides = array<i32>} : memref<1x1x128xf32, #tpu.memory_space<vmem>>, vector<1x1x128xf32>,
    %c0_12 = arith.constant 0 : index
    %c0_13 = arith.constant 0 : index
    %c0_14 = arith.constant 0 : index
    %17 = vector.load %arg5[%c0_12, %c0_13, %c0_14] : memref<1x1x128xi32, #tpu.memory_space<vmem>>, vector<1x1x128xi32>
    %18 = arith.extui %6 : vector<4x128xi1> to vector<4x128xi32>
    %cst_15 = arith.constant dense<0> : vector<128xi32>
    %19 = vector.multi_reduction <add>, %18, %cst_15 [0] : vector<4x128xi32> to vector<128xi32>
    %20 = vector.shape_cast %19 : vector<128xi32> to vector<1x128xi32>
    %21 = vector.shape_cast %20 : vector<1x128xi32> to vector<1x1x128xi32>
    %22 = arith.addi %17, %21 : vector<1x1x128xi32>
    %c0_16 = arith.constant 0 : index
    %c0_17 = arith.constant 0 : index
    %c0_18 = arith.constant 0 : index
    %23 = vector.load %arg5[%c0_16, %c0_17, %c0_18] : memref<1x1x128xi32, #tpu.memory_space<vmem>>, vector<1x1x128xi32>
    tpu.vector_store %arg5[%c0_16, %c0_17, %c0_18], %22 {strides = array<i32>} : memref<1x1x128xi32, #tpu.memory_space<vmem>>, vector<1x1x128xi32>,
    return
  }
  func.func @transform_0(%arg0: i32, %arg1: i32) -> (i32, i32) {
    %c1_i32 = arith.constant 1 : i32
    %0 = arith.muli %arg0, %c1_i32 : i32
    %1 = arith.addi %0, %arg1 : i32
    %c0_i32 = arith.constant 0 : i32
    %2 = arith.minsi %1, %c0_i32 : i32
    %c0_i32_0 = arith.constant 0 : i32
    %c0_i32_1 = arith.constant 0 : i32
    return %2, %c0_i32_0 : i32, i32
  }
  func.func @transform_1(%arg0: i32, %arg1: i32) -> (i32, i32) {
    %c1_i32 = arith.constant 1 : i32
    %0 = arith.muli %arg0, %c1_i32 : i32
    %1 = arith.addi %0, %arg1 : i32
    %c0_i32 = arith.constant 0 : i32
    %2 = arith.minsi %1, %c0_i32 : i32
    %c0_i32_0 = arith.constant 0 : i32
    %c0_i32_1 = arith.constant 0 : i32
    return %2, %c0_i32_0 : i32, i32
  }
  func.func @transform_2(%arg0: i32, %arg1: i32) -> (i32, i32, i32) {
    %c0_i32 = arith.constant 0 : i32
    %c0_i32_0 = arith.constant 0 : i32
    %c0_i32_1 = arith.constant 0 : i32
    return %arg0, %c0_i32, %c0_i32_0 : i32, i32, i32
  }
  func.func @transform_3(%arg0: i32, %arg1: i32) -> (i32, i32, i32) {
    %c0_i32 = arith.constant 0 : i32
    %c0_i32_0 = arith.constant 0 : i32
    %c0_i32_1 = arith.constant 0 : i32
    return %arg0, %c0_i32, %c0_i32_0 : i32, i32, i32
  }
}

</mosaic_0001>

<bundles_post_ra>
// kernel: tpu_custom_call.1
= control target key start
LH: loop header
LB: loop body
LE: loop exit
PB: predicated region body
PF: predicated region fallthrough
CT: control target
= control target key end

     0   :  { %9 = vsyncpa [#allocation3], 0  ;;  %s307_s0 = inlined_call_operand.hbm [shape: f32[4,128], index: 0, kind: input, shape index: {}]   ;;  %s308_s1 = inlined_call_operand.hbm [shape: f32[4,128], index: 1, kind: input, shape index: {}]   ;;  %s309_s2 = inlined_call_operand.hbm [shape: f32[1,1,128], index: 2, kind: output, shape index: {0}]   ;;  %s310_s3 = inlined_call_operand.hbm [shape: s32[1,1,128], index: 3, kind: output, shape index: {1}]  }
   0x1   :  { %10 = vsyncpa [#allocation6], 0 }
   0x2   :  { %11 = vsyncpa [#allocation4], 0 }
   0x3   :  { %12 = vsyncpa [#allocation9], 0  ;;  %s225_s12 = smov [#allocation2]   ;;  %s226_s14 = smov [#allocation5]  }
   0x4   :  { %s24_s13 = sshll.u32 %s225_s12, 4  ;;  %s39_s15 = sshll.u32 %s226_s14, 4  ;;  %s25_s13 = int_to_ptr.vmem [resolvable:$true] %s24_s13  ;;  %s40_s15 = int_to_ptr.vmem [resolvable:$true] %s39_s15 }
   0x5   :  { %s129_s18 = scalar_lea.hbm %s307_s0, 64 }
   0x6   :  { %p130_p0 = scmp.ne.s32.totalorder %s307_s0, %s129_s18  ;;  %p133_p1 = scmp.lt.u32.totalorder %s129_s18, %s307_s0 }
   0x8   :  { %p135_p2 = pnand %p133_p1, %p130_p0 }
   0xa   :  { %138 = shalt.err (!%p135_p2)
}
   0xb   :  { %s139_s23 = scalar_lea.vmem %s25_s13, 64  ;;  %p144_p4 = scmp.lt.s32.totalorder %s25_s13, %s25_s13 }
   0xc   :  { %p140_p3 = scmp.ne.s32.totalorder %s25_s13, %s139_s23  ;;  %p145_p5 = scmp.lt.s32.totalorder %s139_s23, %s139_s23 }
   0xe   :  { %p146_p6 = por %p145_p5, %p144_p4 }
  0x10   :  { %p147_p7 = pnand %p146_p6, %p140_p3 }
  0x12   :  { %150 = shalt.err (!%p147_p7)
}
  0x13   :  { %27 = dma.hbm_to_vmem [thread:$0]  %s307_s0, 64, %s25_s13, [#allocation3]  }
  0x14   :  { %s151_s28 = scalar_lea.hbm %s308_s1, 64 }
  0x15   :  { %p152_p8 = scmp.ne.s32.totalorder %s308_s1, %s151_s28  ;;  %p155_p9 = scmp.lt.u32.totalorder %s151_s28, %s308_s1 }
  0x17   :  { %p157_p10 = pnand %p155_p9, %p152_p8 }
  0x19   :  { %160 = shalt.err (!%p157_p10)
}
  0x1a   :  { %s161_s6 = scalar_lea.vmem %s40_s15, 64  ;;  %p166_p12 = scmp.lt.s32.totalorder %s40_s15, %s40_s15 }
  0x1b   :  { %p162_p11 = scmp.ne.s32.totalorder %s40_s15, %s161_s6  ;;  %p167_p13 = scmp.lt.s32.totalorder %s161_s6, %s161_s6 }
  0x1d   :  { %p168_p0 = por %p167_p13, %p166_p12 }
  0x1f   :  { %p169_p1 = pnand %p168_p0, %p162_p11 }
  0x21   :  { %172 = shalt.err (!%p169_p1)
}
  0x22   :  { %42 = dma.hbm_to_vmem [thread:$0]  %s308_s1, 64, %s40_s15, [#allocation6]  }
  0x23   :  { %217 = dma.done.wait [#allocation3], 64  }
  0x24   :  { %218 = vsyncadd [#allocation3], 4294967232 }
  0x25   :  { %219 = dma.done.wait [#allocation6], 64  }
  0x26   :  { %220 = vsyncadd [#allocation6], 4294967232  ;;  %v227_v0 = vmov 0.0   ;;  %v228_v1 = vmov 0   ;;  %v61_v2 = vld [vmem:[#allocation2] sm:$0xf] }
  0x27   :  { %59 = vst [vmem:[#allocation7] sm:$0x1] %v227_v0  ;;  %60 = vst [vmem:[#allocation8] sm:$0x1] %v228_v1  ;;  %v62_v3 = vld [vmem:[#allocation5] sm:$0xf] }
  0x28   :  { %vm68_vm0 = vcmask 1043456   ;;  %vm63_vm1 = vcmp.ge.f32.partialorder %v62_v3, 0.0  ;;  %v64_v4 = vsub.f32 %v61_v2, %v62_v3  ;;  %s229_s1 = smov [#allocation8]   ;;  %s230_s9 = smov [#allocation7]  }
  0x29   :  { %v79_v5 = vsel %vm63_vm1, 1, %v228_v1  ;;  %s105_s8 = sshll.u32 %s229_s1, 4  ;;  %s95_s10 = sshll.u32 %s230_s9, 4  ;;  %s106_s8 = int_to_ptr.vmem [resolvable:$true] %s105_s8  ;;  %s275_s10 = int_to_ptr.vmem [resolvable:$true] %s95_s10 }
  0x2a   :  { %v65_v6 = vsel %vm63_vm1, %v64_v4, 0.0  ;;  %v80_v7 = vsel %vm68_vm0, %v79_v5, 0  ;;  %s173_s11 = scalar_lea.vmem %s106_s8, 16  ;;  %s177_s12 = scalar_lea.vmem %s106_s8, 32 }
  0x2b   :  { %v67_v8 = vmul.f32 %v65_v6, %v65_v6  ;;  %v81_v9 = vrot.slane %v80_v7, 4  ;;  %p174_p2 = scmp.ne.s32.totalorder %s106_s8, %s173_s11  ;;  %p178_p3 = scmp.lt.s32.totalorder %s106_s8, %s106_s8 }
  0x2c   :  { %p179_p4 = scmp.lt.s32.totalorder %s177_s12, %s173_s11 }
  0x2d   :  { %v69_v10 = vsel %vm68_vm0, %v67_v8, 0.0  ;;  %v82_v11 = vadd.s32 %v81_v9, %v80_v7 }
  0x2e   :  { %v70_v12 = vrot.slane %v69_v10, 4  ;;  %v78_v19 = vld [vmem:[#allocation8] sm:$0x1]  ;;  %v66_v22 = vld [vmem:[#allocation7] sm:$0x1]  ;;  %p180_p5 = por %p179_p4, %p178_p3 }
  0x2f   :  { %v83_v13 = vrot.slane %v82_v11, 2 }
  0x30   :  { %v71_v14 = vadd.f32 %v70_v12, %v69_v10  ;;  %p181_p6 = pnand %p180_p5, %p174_p2 }
  0x31   :  { %v84_v15 = vadd.s32 %v83_v13, %v82_v11 }
  0x32   :  { %v72_v16 = vrot.slane %v71_v14, 2 }
  0x33   :  { %v85_v17 = vrot.slane %v84_v15, 1 }
  0x34   :  { %v73_v18 = vadd.f32 %v72_v16, %v71_v14 }
  0x35   :  { %v86_v20 = vadd.s32 %v85_v17, %v84_v15 }
  0x36   :  { %v74_v21 = vrot.slane %v73_v18, 1 }
  0x37   :  { %v87_v23 = vadd.s32 %v86_v20, %v78_v19 }
  0x38   :  { %v75_v24 = vadd.f32 %v74_v21, %v73_v18 }
  0x39   :  { %88 = vst [vmem:[#allocation8] sm:$0x1] %v87_v23 }
  0x3a   :  { %v76_v25 = vadd.f32 %v75_v24, %v66_v22 }
  0x3b   :  { %184 = shalt.err (!%p181_p6)
}
  0x3c   :  { %s185_s15 = scalar_lea.hbm %s310_s3, 16 }
  0x3d   :  { %p186_p7 = scmp.ne.s32.totalorder %s310_s3, %s185_s15  ;;  %p189_p8 = scmp.lt.u32.totalorder %s185_s15, %s310_s3 }
  0x3f   :  { %p191_p9 = pnand %p189_p8, %p186_p7 }
  0x41   :  { %194 = shalt.err (!%p191_p9)
}
  0x42   :  { %108 = dma.vmem_to_hbm [thread:$0]  %s106_s8, 16, %s310_s3, [#allocation9]   ;;  %77 = vst [vmem:[#allocation7] sm:$0x1] %v76_v25 }
  0x43   :  { %s195_s22 = scalar_lea.vmem %s275_s10, 16  ;;  %s199_s23 = scalar_lea.vmem %s275_s10, 32 }
  0x44   :  { %p196_p10 = scmp.ne.s32.totalorder %s275_s10, %s195_s22  ;;  %p200_p11 = scmp.lt.s32.totalorder %s275_s10, %s275_s10 }
  0x45   :  { %p201_p12 = scmp.lt.s32.totalorder %s199_s23, %s195_s22 }
  0x47   :  { %p202_p13 = por %p201_p12, %p200_p11 }
  0x49   :  { %p203_p0 = pnand %p202_p13, %p196_p10 }
  0x4b   :  { %206 = shalt.err (!%p203_p0)
}
  0x4c   :  { %s207_s26 = scalar_lea.hbm %s309_s2, 16 }
  0x4d   :  { %p208_p1 = scmp.ne.s32.totalorder %s309_s2, %s207_s26  ;;  %p211_p2 = scmp.lt.u32.totalorder %s207_s26, %s309_s2 }
  0x4f   :  { %p213_p3 = pnand %p211_p2, %p208_p1 }
  0x51   :  { %216 = shalt.err (!%p213_p3)
}
  0x52   :  { %98 = dma.vmem_to_hbm [thread:$0]  %s275_s10, 16, %s309_s2, [#allocation4]  }
  0x53   :  { %221 = dma.done.wait [#allocation4], 16  }
  0x54   :  { %222 = vsyncadd [#allocation4], 4294967280 }
  0x55   :  { %223 = dma.done.wait [#allocation9], 16  }
  0x56   :  { %224 = vsyncadd [#allocation9], 4294967280 }
  0x57   :  { %115 = vsyncpa [#allocation3], 1 }
  0x58   :  { %116 = vsyncpa [#allocation6], 1 }
  0x59   :  { %117 = vsyncpa [#allocation4], 1 }
  0x5a   :  { %118 = vsyncpa [#allocation9], 1 }

</bundles_post_ra>
